<compile_context>
chip_gen: v7x
topology: tpu7x:2x2x1
jax: 0.10.0
libtpu: 0.0.40
codegen_flags: <defaults>
</compile_context>

<pallas_src>
import jax
import jax.numpy as jnp
from jax.experimental import pallas as pl
from jax.experimental.pallas import tpu as pltpu


def mlp_kernel(x_ref, w1_ref, b1_ref, w2_ref, b2_ref, w3_ref, b3_ref,
               w4_ref, b4_ref, o_ref):
    # ---- Layer 1 (Linear(1, H)) fused with the mean over dim 0 ----
    # x_ref: (T_pad, tile_n) with zero-padded T rows; w1_ref: (H, 1) already
    # holds w1^T / T, so (sum_T x) * w1_ref == mean_T(x) * w1, shape (H, tile_n).
    s = jnp.sum(x_ref[...], axis=0, keepdims=True)                  # (1, tile_n)  XLU
    h = jnp.maximum(w1_ref[...] * s + b1_ref[...], 0.0)             # (H, tile_n)  VPU

    mm_dtype = w2_ref.dtype
    # ---- Layer 2: Linear(H, H) + ReLU (weights pre-transposed to (out, in)) ----
    h = jnp.dot(w2_ref[...], h.astype(mm_dtype),
                preferred_element_type=jnp.float32) + b2_ref[...]
    h = jnp.maximum(h, 0.0)
    # ---- Layer 3: Linear(H, H) + ReLU ----
    h = jnp.dot(w3_ref[...], h.astype(mm_dtype),
                preferred_element_type=jnp.float32) + b3_ref[...]
    h = jnp.maximum(h, 0.0)
    # ---- Layer 4: Linear(H, O), O padded to 8 output sublanes (no activation) ----
    o_ref[...] = (jnp.dot(w4_ref[...], h.astype(mm_dtype),
                          preferred_element_type=jnp.float32) + b4_ref[...])


def _round_up(a, b):
    return (a + b - 1) // b * b


def mlp_forward(x, params, *, tile_n=2048, compute_dtype=jnp.bfloat16):
    """x: (seq, ...) float32; mean is taken over dim 0 (PyTorch forward).
    params: weights stored (in, out), biases (1, out).  Returns (N, out_dim)."""
    T = x.shape[0]
    N = x.size // T
    x2 = x.reshape(T, N).astype(jnp.float32)

    H = params["w2"].shape[0]
    out_dim = params["w4"].shape[1]

    LANE, SUB = 128, 8
    T_pad = _round_up(T, SUB)
    N_pad = _round_up(N, LANE)
    out_pad = _round_up(out_dim, SUB)            # pad to 8 sublanes, not 128 lanes

    tile_n = max(LANE, _round_up(min(tile_n, N_pad), LANE))
    # Keep >= 2 grid steps when N allows so the "parallel" axis really splits
    # across v7x's two TensorCores and the x/out DMAs double-buffer.
    if N_pad >= 2 * LANE and N_pad // tile_n < 2:
        tile_n = _round_up((N_pad + 1) // 2, LANE)
    N_pad = _round_up(N_pad, tile_n)
    grid = (N_pad // tile_n,)

    # Only materialize a zero-padded copy of x when actually needed.
    if T == T_pad and N == N_pad:
        x_p = x2
    else:
        x_p = jnp.zeros((T_pad, N_pad), jnp.float32).at[:T, :N].set(x2)

    # Layer-1 weight fused with the mean: column (H, 1) of w1 / T.
    w1_col = (params["w1"].T / T).astype(jnp.float32)                # (H, 1)
    b1_col = params["b1"].reshape(1, H).T.astype(jnp.float32)        # (H, 1)
    # Hidden weights pre-transposed to (out, in) and cast once for the MXU.
    w2_t = params["w2"].T.astype(compute_dtype)                      # (H, H)
    b2_col = params["b2"].reshape(1, H).T.astype(jnp.float32)        # (H, 1)
    w3_t = params["w3"].T.astype(compute_dtype)                      # (H, H)
    b3_col = params["b3"].reshape(1, H).T.astype(jnp.float32)        # (H, 1)
    # Output layer padded to 8 sublanes (rows); padded rows are exactly zero.
    w4_t = jnp.zeros((out_pad, H), jnp.float32).at[:out_dim, :].set(
        params["w4"].T).astype(compute_dtype)                        # (8, H)
    b4_col = jnp.zeros((out_pad, 1), jnp.float32).at[:out_dim, :].set(
        params["b4"].reshape(1, out_dim).T)                          # (8, 1)

    const = lambda i: (0, 0)   # resident weights/biases: same block every step

    wsize = jnp.dtype(compute_dtype).itemsize
    flops = 2 * N_pad * (2 * H * H + H * out_pad) + N_pad * (T_pad + 3 * H)
    bytes_accessed = int(
        4 * (x_p.size + w1_col.size + b1_col.size + b2_col.size
             + b3_col.size + b4_col.size + N_pad * out_pad)
        + wsize * (w2_t.size + w3_t.size + w4_t.size))

    out_padded = pl.pallas_call(
        mlp_kernel,
        out_shape=jax.ShapeDtypeStruct((out_pad, N_pad), jnp.float32),
        grid_spec=pltpu.PrefetchScalarGridSpec(
            num_scalar_prefetch=0,
            grid=grid,
            in_specs=[
                pl.BlockSpec((T_pad, tile_n), lambda i: (0, i)),   # x tile
                pl.BlockSpec((H, 1), const),                       # w1^T / T
                pl.BlockSpec((H, 1), const),                       # b1
                pl.BlockSpec((H, H), const),                       # w2^T
                pl.BlockSpec((H, 1), const),                       # b2
                pl.BlockSpec((H, H), const),                       # w3^T
                pl.BlockSpec((H, 1), const),                       # b3
                pl.BlockSpec((out_pad, H), const),                 # w4^T (8-row pad)
                pl.BlockSpec((out_pad, 1), const),                 # b4
            ],
            out_specs=pl.BlockSpec((out_pad, tile_n), lambda i: (0, i)),
        ),
        compiler_params=pltpu.CompilerParams(
            dimension_semantics=("parallel",),
            vmem_limit_bytes=32 * 1024 * 1024,   # safe on v7x's 64 MiB VMEM too
        ),
        cost_estimate=pl.CostEstimate(
            flops=flops, transcendentals=0, bytes_accessed=bytes_accessed),
    )(x_p, w1_col, b1_col, w2_t, b2_col, w3_t, b3_col, w4_t, b4_col)

    # Slice off padded output rows / lane padding and return (N, out_dim).
    return out_padded[:out_dim, :N].T


def init_params(key, in_features, hidden, out_features):
    """Deterministic PyTorch-like init: U(-1/sqrt(fan_in), 1/sqrt(fan_in)).
    Weights stored as (in, out) so the reference computes x @ W + b."""
    dims = [(in_features, hidden), (hidden, hidden), (hidden, hidden),
            (hidden, out_features)]
    params = {}
    for i, (fi, fo) in enumerate(dims, start=1):
        key, kw, kb = jax.random.split(key, 3)
        bound = 1.0 / jnp.sqrt(fi)
        params[f"w{i}"] = jax.random.uniform(kw, (fi, fo), jnp.float32, -bound, bound)
        params[f"b{i}"] = jax.random.uniform(kb, (1, fo), jnp.float32, -bound, bound)
    return params


def mlp_reference(x, params):
    """Plain-JAX reference mirroring the PyTorch forward."""
    h = jnp.mean(x, axis=0).reshape(-1, 1)
    h = jnp.maximum(h @ params["w1"] + params["b1"], 0.0)
    h = jnp.maximum(h @ params["w2"] + params["b2"], 0.0)
    h = jnp.maximum(h @ params["w3"] + params["b3"], 0.0)
    return h @ params["w4"] + params["b4"]


if __name__ == "__main__":
    hidden_size = 128
    input_feat = 50          # feature width of the raw x (the script's input_size)
    output_size = 2
    seq, batch = 8, 2

    key = jax.random.PRNGKey(0)
    kx, kp = jax.random.split(key)
    x = jax.random.normal(kx, (seq, batch, input_feat), jnp.float32)

    # First Linear has in_features=1 (forced by .view(-1, 1) in the forward).
    params = init_params(kp, 1, hidden_size, output_size)

    ref = mlp_reference(x, params)

    # f32 validation path (bit-comparable math, tight tolerance).
    out_f32 = jax.block_until_ready(
        mlp_forward(x, params, compute_dtype=jnp.float32))
    assert out_f32.shape == (batch * input_feat, output_size), out_f32.shape
    assert jnp.allclose(out_f32, ref, atol=1e-4, rtol=1e-4), "f32 mismatch vs reference"

    # Default performance path: bf16 matmul operands, f32 accumulation / bias / ReLU.
    out_bf16 = jax.block_until_ready(mlp_forward(x, params))
    assert out_bf16.shape == (batch * input_feat, output_size), out_bf16.shape
    assert jnp.allclose(out_bf16, ref, atol=5e-2, rtol=5e-2), "bf16 mismatch vs reference"

    print("KERNEL_OK")
</pallas_src>

<mosaic_0001>
module attributes {stable_mosaic.version = 11 : i64} {
  func.func @mlp_kernel(%arg0: i32, %arg1: memref<8x128xf32, #tpu.memory_space<vmem>>, %arg2: memref<128x1xf32, #tpu.memory_space<vmem>>, %arg3: memref<128x1xf32, #tpu.memory_space<vmem>>, %arg4: memref<128x128xf32, #tpu.memory_space<vmem>>, %arg5: memref<128x1xf32, #tpu.memory_space<vmem>>, %arg6: memref<128x128xf32, #tpu.memory_space<vmem>>, %arg7: memref<128x1xf32, #tpu.memory_space<vmem>>, %arg8: memref<8x128xf32, #tpu.memory_space<vmem>>, %arg9: memref<8x1xf32, #tpu.memory_space<vmem>>, %arg10: memref<8x128xf32, #tpu.memory_space<vmem>>) attributes {dimension_semantics = [#tpu.dimension_semantics<parallel>], iteration_bounds = array<i64: 1>, scalar_prefetch = 0 : i64, scratch_operands = 0 : i64, tpu.core_type = #tpu.core_type<tc>, window_params = [{transform_indices = @transform_0, window_bounds = array<i64: 8, 128>}, {pipeline_mode = #tpu.pipeline_mode<synchronous>, transform_indices = @transform_1, window_bounds = array<i64: 128, 1>}, {pipeline_mode = #tpu.pipeline_mode<synchronous>, transform_indices = @transform_2, window_bounds = array<i64: 128, 1>}, {pipeline_mode = #tpu.pipeline_mode<synchronous>, transform_indices = @transform_3, window_bounds = array<i64: 128, 128>}, {pipeline_mode = #tpu.pipeline_mode<synchronous>, transform_indices = @transform_4, window_bounds = array<i64: 128, 1>}, {pipeline_mode = #tpu.pipeline_mode<synchronous>, transform_indices = @transform_5, window_bounds = array<i64: 128, 128>}, {pipeline_mode = #tpu.pipeline_mode<synchronous>, transform_indices = @transform_6, window_bounds = array<i64: 128, 1>}, {pipeline_mode = #tpu.pipeline_mode<synchronous>, transform_indices = @transform_7, window_bounds = array<i64: 8, 128>}, {pipeline_mode = #tpu.pipeline_mode<synchronous>, transform_indices = @transform_8, window_bounds = array<i64: 8, 1>}, {transform_indices = @transform_9, window_bounds = array<i64: 8, 128>}]} {
    %c0 = arith.constant 0 : index
    %c0_0 = arith.constant 0 : index
    %0 = vector.load %arg1[%c0, %c0_0] : memref<8x128xf32, #tpu.memory_space<vmem>>, vector<8x128xf32>
    %cst = arith.constant dense<0.000000e+00> : vector<128xf32>
    %1 = vector.multi_reduction <add>, %0, %cst [0] : vector<8x128xf32> to vector<128xf32>
    %2 = vector.shape_cast %1 : vector<128xf32> to vector<1x128xf32>
    %c0_1 = arith.constant 0 : index
    %c0_2 = arith.constant 0 : index
    %3 = vector.load %arg2[%c0_1, %c0_2] : memref<128x1xf32, #tpu.memory_space<vmem>>, vector<128x1xf32>
    %4 = vector.broadcast %3 : vector<128x1xf32> to vector<128x128xf32>
    %5 = vector.broadcast %2 : vector<1x128xf32> to vector<128x128xf32>
    %6 = arith.mulf %4, %5 : vector<128x128xf32>
    %c0_3 = arith.constant 0 : index
    %c0_4 = arith.constant 0 : index
    %7 = vector.load %arg3[%c0_3, %c0_4] : memref<128x1xf32, #tpu.memory_space<vmem>>, vector<128x1xf32>
    %8 = vector.broadcast %7 : vector<128x1xf32> to vector<128x128xf32>
    %9 = arith.addf %6, %8 : vector<128x128xf32>
    %cst_5 = arith.constant 0.000000e+00 : f32
    %10 = vector.broadcast %cst_5 : f32 to vector<128x128xf32>
    %11 = arith.maximumf %9, %10 : vector<128x128xf32>
    %c0_6 = arith.constant 0 : index
    %c0_7 = arith.constant 0 : index
    %12 = vector.load %arg4[%c0_6, %c0_7] : memref<128x128xf32, #tpu.memory_space<vmem>>, vector<128x128xf32>
    %cst_8 = arith.constant dense<0.000000e+00> : vector<128x128xf32>
    %13 = tpu.matmul %12, %11, %cst_8 {dimension_numbers = #tpu.dot_dimension_numbers<[1], [0], [0], [1], [0, 0, 1, 1], [], []>} : vector<128x128xf32>, vector<128x128xf32>, vector<128x128xf32> -> vector<128x128xf32>
    %c0_9 = arith.constant 0 : index
    %c0_10 = arith.constant 0 : index
    %14 = vector.load %arg5[%c0_9, %c0_10] : memref<128x1xf32, #tpu.memory_space<vmem>>, vector<128x1xf32>
    %15 = vector.broadcast %14 : vector<128x1xf32> to vector<128x128xf32>
    %16 = arith.addf %13, %15 : vector<128x128xf32>
    %cst_11 = arith.constant 0.000000e+00 : f32
    %17 = vector.broadcast %cst_11 : f32 to vector<128x128xf32>
    %18 = arith.maximumf %16, %17 : vector<128x128xf32>
    %c0_12 = arith.constant 0 : index
    %c0_13 = arith.constant 0 : index
    %19 = vector.load %arg6[%c0_12, %c0_13] : memref<128x128xf32, #tpu.memory_space<vmem>>, vector<128x128xf32>
    %cst_14 = arith.constant dense<0.000000e+00> : vector<128x128xf32>
    %20 = tpu.matmul %19, %18, %cst_14 {dimension_numbers = #tpu.dot_dimension_numbers<[1], [0], [0], [1], [0, 0, 1, 1], [], []>} : vector<128x128xf32>, vector<128x128xf32>, vector<128x128xf32> -> vector<128x128xf32>
    %c0_15 = arith.constant 0 : index
    %c0_16 = arith.constant 0 : index
    %21 = vector.load %arg7[%c0_15, %c0_16] : memref<128x1xf32, #tpu.memory_space<vmem>>, vector<128x1xf32>
    %22 = vector.broadcast %21 : vector<128x1xf32> to vector<128x128xf32>
    %23 = arith.addf %20, %22 : vector<128x128xf32>
    %cst_17 = arith.constant 0.000000e+00 : f32
    %24 = vector.broadcast %cst_17 : f32 to vector<128x128xf32>
    %25 = arith.maximumf %23, %24 : vector<128x128xf32>
    %c0_18 = arith.constant 0 : index
    %c0_19 = arith.constant 0 : index
    %26 = vector.load %arg8[%c0_18, %c0_19] : memref<8x128xf32, #tpu.memory_space<vmem>>, vector<8x128xf32>
    %cst_20 = arith.constant dense<0.000000e+00> : vector<8x128xf32>
    %27 = tpu.matmul %26, %25, %cst_20 {dimension_numbers = #tpu.dot_dimension_numbers<[1], [0], [0], [1], [0, 0, 1, 1], [], []>} : vector<8x128xf32>, vector<128x128xf32>, vector<8x128xf32> -> vector<8x128xf32>
    %c0_21 = arith.constant 0 : index
    %c0_22 = arith.constant 0 : index
    %28 = vector.load %arg9[%c0_21, %c0_22] : memref<8x1xf32, #tpu.memory_space<vmem>>, vector<8x1xf32>
    %29 = vector.broadcast %28 : vector<8x1xf32> to vector<8x128xf32>
    %30 = arith.addf %27, %29 : vector<8x128xf32>
    %c0_23 = arith.constant 0 : index
    %c0_24 = arith.constant 0 : index
    %31 = vector.load %arg10[%c0_23, %c0_24] : memref<8x128xf32, #tpu.memory_space<vmem>>, vector<8x128xf32>
    tpu.vector_store %arg10[%c0_23, %c0_24], %30 {strides = array<i32>} : memref<8x128xf32, #tpu.memory_space<vmem>>, vector<8x128xf32>,
    return
  }
  func.func @transform_0(%arg0: i32) -> (i32, i32) {
    %c0_i32 = arith.constant 0 : i32
    %c0_i32_0 = arith.constant 0 : i32
    return %c0_i32, %arg0 : i32, i32
  }
  func.func @transform_1(%arg0: i32) -> (i32, i32) {
    %c0_i32 = arith.constant 0 : i32
    %c0_i32_0 = arith.constant 0 : i32
    %c0_i32_1 = arith.constant 0 : i32
    return %c0_i32, %c0_i32_0 : i32, i32
  }
  func.func @transform_2(%arg0: i32) -> (i32, i32) {
    %c0_i32 = arith.constant 0 : i32
    %c0_i32_0 = arith.constant 0 : i32
    %c0_i32_1 = arith.constant 0 : i32
    return %c0_i32, %c0_i32_0 : i32, i32
  }
  func.func @transform_3(%arg0: i32) -> (i32, i32) {
    %c0_i32 = arith.constant 0 : i32
    %c0_i32_0 = arith.constant 0 : i32
    %c0_i32_1 = arith.constant 0 : i32
    return %c0_i32, %c0_i32_0 : i32, i32
  }
  func.func @transform_4(%arg0: i32) -> (i32, i32) {
    %c0_i32 = arith.constant 0 : i32
    %c0_i32_0 = arith.constant 0 : i32
    %c0_i32_1 = arith.constant 0 : i32
    return %c0_i32, %c0_i32_0 : i32, i32
  }
  func.func @transform_5(%arg0: i32) -> (i32, i32) {
    %c0_i32 = arith.constant 0 : i32
    %c0_i32_0 = arith.constant 0 : i32
    %c0_i32_1 = arith.constant 0 : i32
    return %c0_i32, %c0_i32_0 : i32, i32
  }
  func.func @transform_6(%arg0: i32) -> (i32, i32) {
    %c0_i32 = arith.constant 0 : i32
    %c0_i32_0 = arith.constant 0 : i32
    %c0_i32_1 = arith.constant 0 : i32
    return %c0_i32, %c0_i32_0 : i32, i32
  }
  func.func @transform_7(%arg0: i32) -> (i32, i32) {
    %c0_i32 = arith.constant 0 : i32
    %c0_i32_0 = arith.constant 0 : i32
    %c0_i32_1 = arith.constant 0 : i32
    return %c0_i32, %c0_i32_0 : i32, i32
  }
  func.func @transform_8(%arg0: i32) -> (i32, i32) {
    %c0_i32 = arith.constant 0 : i32
    %c0_i32_0 = arith.constant 0 : i32
    %c0_i32_1 = arith.constant 0 : i32
    return %c0_i32, %c0_i32_0 : i32, i32
  }
  func.func @transform_9(%arg0: i32) -> (i32, i32) {
    %c0_i32 = arith.constant 0 : i32
    %c0_i32_0 = arith.constant 0 : i32
    return %c0_i32, %arg0 : i32, i32
  }
}

</mosaic_0001>

<bundles_post_ra>
// kernel: tpu_custom_call.1
= control target key start
LH: loop header
LB: loop body
LE: loop exit
PB: predicated region body
PF: predicated region fallthrough
CT: control target
= control target key end

     0   :  { %v1265_v2 = vmov 0   ;;  %s1655_s0 = inlined_call_operand.vmem [shape: f32[8,128], index: 0, kind: input, shape index: {}]   ;;  %s1656_s1 = inlined_call_operand.vmem [shape: f32[128,1], index: 1, kind: input, shape index: {}]   ;;  %s1657_s2 = inlined_call_operand.vmem [shape: f32[128,1], index: 2, kind: input, shape index: {}]   ;;  %s1658_s3 = inlined_call_operand.vmem [shape: f32[128,128], index: 3, kind: input, shape index: {}]   ;;  %s1659_s4 = inlined_call_operand.vmem [shape: f32[128,1], index: 4, kind: input, shape index: {}]   ;;  %s1660_s5 = inlined_call_operand.vmem [shape: f32[128,128], index: 5, kind: input, shape index: {}]   ;;  %s1661_s6 = inlined_call_operand.vmem [shape: f32[128,1], index: 6, kind: input, shape index: {}]   ;;  %s1662_s7 = inlined_call_operand.vmem [shape: f32[8,128], index: 7, kind: input, shape index: {}]   ;;  %s1663_s8 = inlined_call_operand.vmem [shape: f32[8,1], index: 8, kind: input, shape index: {}]   ;;  %s1664_s9 = inlined_call_operand.hbm [shape: f32[8,128], index: 9, kind: output, shape index: {}]  }
   0x1   :  { %v152_v0 = vld [vmem:[%s1657_s2] sm:$0xff]  ;;  %1240 = vset.pattern.permute.xlu1 %v1265_v2  ;;  %1239 = vset.pattern.permute.xlu0 %v1265_v2  ;;  %v153_v3 = vld [vmem:[%s1657_s2 + $0x8] sm:$0xff]  ;;  %v43_v5 = vld [vmem:[%s1656_s1 + $0x18] sm:$0xff] }
   0x2   :  { %v40_v1 = vld [vmem:[%s1656_s1] sm:$0xff]  ;;  %170 = vperm.xlu1 %1240, %v152_v0   ;;  %v41_v4 = vld [vmem:[%s1656_s1 + $0x8] sm:$0xff]  ;;  %v42_v6 = vld [vmem:[%s1656_s1 + $0x10] sm:$0xff] }
   0x3   :  { %58 = vperm.xlu0 %1239, %v40_v1   ;;  %v155_v7 = vld [vmem:[%s1657_s2 + $0x18] sm:$0xff]  ;;  %v154_v8 = vld [vmem:[%s1657_s2 + $0x10] sm:$0xff]  ;;  %v45_v9 = vld [vmem:[%s1656_s1 + $0x28] sm:$0xff] }
   0x4   :  { %v44_v10 = vld [vmem:[%s1656_s1 + $0x20] sm:$0xff]  ;;  %v157_v11 = vld [vmem:[%s1657_s2 + $0x28] sm:$0xff] }
   0x5   :  { %v156_v12 = vld [vmem:[%s1657_s2 + $0x20] sm:$0xff] }
   0x6   :  { %175 = vperm.xlu1 %1240, %v153_v3  }
   0x7   :  { %63 = vperm.xlu0 %1239, %v41_v4  }
   0xa   :  { %73 = vperm.xlu1 %1240, %v43_v5  }
   0xb   :  { %68 = vperm.xlu0 %1239, %v42_v6  }
   0xe   :  { %185 = vperm.xlu1 %1240, %v155_v7  }
   0xf   :  { %180 = vperm.xlu0 %1239, %v154_v8  }
  0x12   :  { %83 = vperm.xlu1 %1240, %v45_v9  }
  0x13   :  { %78 = vperm.xlu0 %1239, %v44_v10  }
  0x16   :  { %195 = vperm.xlu1 %1240, %v157_v11  }
  0x17   :  { %190 = vperm.xlu0 %1239, %v156_v12  }
  0x18   :  { %14 = vsyncpa [#allocation3], 0  ;;  %v47_v13 = vld [vmem:[%s1656_s1 + $0x38] sm:$0xff]  ;;  %v46_v14 = vld [vmem:[%s1656_s1 + $0x30] sm:$0xff]  ;;  %vm1267_vm0 = vmmov 0   ;;  %s1269_s13 = smov [#allocation2]  }
  0x19   :  { %v159_v15 = vld [vmem:[%s1657_s2 + $0x38] sm:$0xff]  ;;  %v158_v16 = vld [vmem:[%s1657_s2 + $0x30] sm:$0xff]  ;;  %v49_v17 = vld [vmem:[%s1656_s1 + $0x48] sm:$0xff] }
  0x1a   :  { %93 = vperm.xlu1 %1240, %v47_v13   ;;  %v48_v18 = vld [vmem:[%s1656_s1 + $0x40] sm:$0xff]  ;;  %v161_v19 = vld [vmem:[%s1657_s2 + $0x48] sm:$0xff]  ;;  %v51_v21 = vld [vmem:[%s1656_s1 + $0x58] sm:$0xff] }
  0x1b   :  { %88 = vperm.xlu0 %1239, %v46_v14   ;;  %v160_v20 = vld [vmem:[%s1657_s2 + $0x40] sm:$0xff]  ;;  %v50_v22 = vld [vmem:[%s1656_s1 + $0x50] sm:$0xff]  ;;  %v163_v23 = vld [vmem:[%s1657_s2 + $0x58] sm:$0xff] }
  0x1c   :  { %v162_v24 = vld [vmem:[%s1657_s2 + $0x50] sm:$0xff]  ;;  %v53_v25 = vld [vmem:[%s1656_s1 + $0x68] sm:$0xff]  ;;  %v52_v26 = vld [vmem:[%s1656_s1 + $0x60] sm:$0xff] }
  0x1d   :  { %v165_v27 = vld [vmem:[%s1657_s2 + $0x68] sm:$0xff]  ;;  %v164_v28 = vld [vmem:[%s1657_s2 + $0x60] sm:$0xff]  ;;  %v55_v29 = vld [vmem:[%s1656_s1 + $0x78] sm:$0xff] }
  0x1e   :  { %205 = vperm.xlu1 %1240, %v159_v15   ;;  %v54_v30 = vld [vmem:[%s1656_s1 + $0x70] sm:$0xff]  ;;  %v167_v31 = vld [vmem:[%s1657_s2 + $0x78] sm:$0xff]  ;;  %v297_v33 = vld [vmem:[%s1659_s4 + $0x8] sm:$0xff]  ;;  %s910_s1 = sshll.u32 %s1269_s13, 4  ;;  %s911_s1 = int_to_ptr.vmem [resolvable:$true] %s910_s1 }
  0x1f   :  { %200 = vperm.xlu0 %1239, %v158_v16   ;;  %v166_v32 = vld [vmem:[%s1657_s2 + $0x70] sm:$0xff]  ;;  %v296_v34 = vld [vmem:[%s1659_s4] sm:$0xff]  ;;  %v299_v35 = vld [vmem:[%s1659_s4 + $0x18] sm:$0xff]  ;;  %s1241_s14 = scalar_lea.vmem %s911_s1, 128  ;;  %p1246_p1 = scmp.lt.s32.totalorder %s911_s1, %s911_s1 }
  0x20   :  { %v298_v36 = vld [vmem:[%s1659_s4 + $0x10] sm:$0xff]  ;;  %v280_v37 = vld [vmem:[%s1658_s3] sm:$0xff]  ;;  %v301_v38 = vld [vmem:[%s1659_s4 + $0x28] sm:$0xff]  ;;  %p1242_p0 = scmp.ne.s32.totalorder %s911_s1, %s1241_s14  ;;  %p1247_p2 = scmp.lt.s32.totalorder %s1241_s14, %s1241_s14 }
  0x21   :  { %v300_v39 = vld [vmem:[%s1659_s4 + $0x20] sm:$0xff]  ;;  %1031 = vmatprep.mubr.f32.mxu0 %v280_v37  ;;  %v303_v40 = vld [vmem:[%s1659_s4 + $0x38] sm:$0xff]  ;;  %v302_v41 = vld [vmem:[%s1659_s4 + $0x30] sm:$0xff] }
  0x22   :  { %103 = vperm.xlu1 %1240, %v49_v17   ;;  %v305_v42 = vld [vmem:[%s1659_s4 + $0x48] sm:$0xff]  ;;  %v304_v43 = vld [vmem:[%s1659_s4 + $0x40] sm:$0xff]  ;;  %v307_v44 = vld [vmem:[%s1659_s4 + $0x58] sm:$0xff]  ;;  %p1248_p3 = por %p1247_p2, %p1246_p1 }
  0x23   :  { %98 = vperm.xlu0 %1239, %v48_v18   ;;  %v306_v45 = vld [vmem:[%s1659_s4 + $0x50] sm:$0xff]  ;;  %v309_v46 = vld [vmem:[%s1659_s4 + $0x68] sm:$0xff]  ;;  %v308_v47 = vld [vmem:[%s1659_s4 + $0x60] sm:$0xff] }
  0x24   :  { %v311_v48 = vld [vmem:[%s1659_s4 + $0x78] sm:$0xff]  ;;  %v310_v49 = vld [vmem:[%s1659_s4 + $0x70] sm:$0xff]  ;;  %v570_v50 = vld [vmem:[%s1661_s6 + $0x8] sm:$0xff]  ;;  %p1249_p4 = pnand %p1248_p3, %p1242_p0 }
  0x25   :  { %v569_v51 = vld [vmem:[%s1661_s6] sm:$0xff]  ;;  %v572_v52 = vld [vmem:[%s1661_s6 + $0x18] sm:$0xff]  ;;  %v571_v53 = vld [vmem:[%s1661_s6 + $0x10] sm:$0xff] }
  0x26   :  { %215 = vperm.xlu1 %1240, %v161_v19   ;;  %v574_v54 = vld [vmem:[%s1661_s6 + $0x28] sm:$0xff]  ;;  %v573_v55 = vld [vmem:[%s1661_s6 + $0x20] sm:$0xff]  ;;  %v576_v58 = vld [vmem:[%s1661_s6 + $0x38] sm:$0xff] }
  0x27   :  { %210 = vperm.xlu0 %1239, %v160_v20   ;;  %v33_v56 = vld [vmem:[%s1655_s0] sm:$0xff]  ;;  %v575_v59 = vld [vmem:[%s1661_s6 + $0x30] sm:$0xff]  ;;  %v578_v61 = vld [vmem:[%s1661_s6 + $0x48] sm:$0xff] }
  0x28   :  { %v34_v57 = vrot.slane %v33_v56, 4  ;;  %v577_v62 = vld [vmem:[%s1661_s6 + $0x40] sm:$0xff]  ;;  %v580_v0 = vld [vmem:[%s1661_s6 + $0x58] sm:$0xff]  ;;  %v579_v1 = vld [vmem:[%s1661_s6 + $0x50] sm:$0xff] }
  0x29   :  { %v582_v3 = vld [vmem:[%s1661_s6 + $0x68] sm:$0xff]  ;;  %v581_v4 = vld [vmem:[%s1661_s6 + $0x60] sm:$0xff]  ;;  %v584_v6 = vld [vmem:[%s1661_s6 + $0x78] sm:$0xff] }
  0x2a   :  { %113 = vperm.xlu1 %1240, %v51_v21   ;;  %v35_v60 = vadd.f32 %v34_v57, %v33_v56  ;;  %v583_v7 = vld [vmem:[%s1661_s6 + $0x70] sm:$0xff]  ;;  %v827_v9 = vld [vmem:[%s1663_s8] sm:$0xff] }
  0x2b   :  { %108 = vperm.xlu0 %1239, %v50_v22  }
  0x2c   :  { %v36_v63 = vrot.slane %v35_v60, 2 }
  0x2e   :  { %225 = vperm.xlu1 %1240, %v163_v23   ;;  %v37_v2 = vadd.f32 %v36_v63, %v35_v60 }
  0x2f   :  { %220 = vperm.xlu0 %1239, %v162_v24  }
  0x30   :  { %v38_v5 = vrot.slane %v37_v2, 1 }
  0x32   :  { %123 = vperm.xlu1 %1240, %v53_v25   ;;  %v1518_v8 = vadd.f32 %v38_v5, %v37_v2 }
  0x33   :  { %118 = vperm.xlu0 %1239, %v52_v26  }
  0x36   :  { %235 = vperm.xlu1 %1240, %v165_v27  }
  0x37   :  { %230 = vperm.xlu0 %1239, %v164_v28  }
  0x3a   :  { %133 = vperm.xlu1 %1240, %v55_v29  }
  0x3b   :  { %128 = vperm.xlu0 %1239, %v54_v30  }
  0x3e   :  { %245 = vperm.xlu1 %1240, %v167_v31  }
  0x3f   :  { %240 = vperm.xlu0 %1239, %v166_v32  }
  0x42   :  { %319 = vperm.xlu1 %1240, %v297_v33  }
  0x43   :  { %314 = vperm.xlu0 %1239, %v296_v34  }
  0x46   :  { %329 = vperm.xlu1 %1240, %v299_v35  }
  0x47   :  { %324 = vperm.xlu0 %1239, %v298_v36  }
  0x4a   :  { %339 = vperm.xlu1 %1240, %v301_v38  }
  0x4b   :  { %334 = vperm.xlu0 %1239, %v300_v39  }
  0x4e   :  { %349 = vperm.xlu1 %1240, %v303_v40  }
  0x4f   :  { %344 = vperm.xlu0 %1239, %v302_v41  }
  0x52   :  { %359 = vperm.xlu1 %1240, %v305_v42  }
  0x53   :  { %354 = vperm.xlu0 %1239, %v304_v43  }
  0x56   :  { %369 = vperm.xlu1 %1240, %v307_v44  }
  0x57   :  { %364 = vperm.xlu0 %1239, %v306_v45  }
  0x5a   :  { %379 = vperm.xlu1 %1240, %v309_v46  }
  0x5b   :  { %374 = vperm.xlu0 %1239, %v308_v47  }
  0x5e   :  { %389 = vperm.xlu1 %1240, %v311_v48  }
  0x5f   :  { %384 = vperm.xlu0 %1239, %v310_v49  }
  0x62   :  { %592 = vperm.xlu1 %1240, %v570_v50  }
  0x63   :  { %587 = vperm.xlu0 %1239, %v569_v51  }
  0x66   :  { %602 = vperm.xlu1 %1240, %v572_v52  }
  0x67   :  { %597 = vperm.xlu0 %1239, %v571_v53  }
  0x6a   :  { %612 = vperm.xlu1 %1240, %v574_v54  }
  0x6b   :  { %607 = vperm.xlu0 %1239, %v573_v55  }
  0x6e   :  { %622 = vperm.xlu1 %1240, %v576_v58  }
  0x6f   :  { %617 = vperm.xlu0 %1239, %v575_v59  }
  0x72   :  { %632 = vperm.xlu1 %1240, %v578_v61  }
  0x73   :  { %627 = vperm.xlu0 %1239, %v577_v62  }
  0x76   :  { %642 = vperm.xlu1 %1240, %v580_v0  }
  0x77   :  { %637 = vperm.xlu0 %1239, %v579_v1  }
  0x7a   :  { %652 = vperm.xlu1 %1240, %v582_v3  }
  0x7b   :  { %647 = vperm.xlu0 %1239, %v581_v4  }
  0x7e   :  { %662 = vperm.xlu1 %1240, %v584_v6  }
  0x7f   :  { %657 = vperm.xlu0 %1239, %v583_v7  }
  0x81   :  { %v171_v10 = vpop.permute.xlu1 %170 }
  0x82   :  { %v59_v11 = vpop.permute.xlu0 %58 }
  0x83   :  { %v136_v12 = vmul.f32 %v59_v11, %v1518_v8  ;;  %830 = vperm.xlu0 %1239, %v827_v9  }
  0x85   :  { %v176_v13 = vpop.permute.xlu1 %175  ;;  %v248_v15 = vadd.f32 %v171_v10, %v136_v12 }
  0x86   :  { %v64_v14 = vpop.permute.xlu0 %63 }
  0x87   :  { %v137_v16 = vmul.f32 %v64_v14, %v1518_v8  ;;  %v264_v20 = vmax.f32 %v248_v15, 0.0 }
  0x89   :  { %v249_v17 = vadd.f32 %v176_v13, %v137_v16  ;;  %v74_v18 = vpop.permute.xlu1 %73 }
  0x8a   :  { %v69_v19 = vpop.permute.xlu0 %68  ;;  %v139_v22 = vmul.f32 %v74_v18, %v1518_v8 }
  0x8b   :  { %v265_v21 = vmax.f32 %v249_v17, 0.0  ;;  %v138_v23 = vmul.f32 %v69_v19, %v1518_v8 }
  0x8d   :  { %v1146_v24 = vpack.c.bf16 %v265_v21, %v264_v20  ;;  %v186_v25 = vpop.permute.xlu1 %185 }
  0x8e   :  { %v181_v26 = vpop.permute.xlu0 %180  ;;  %v251_v27 = vadd.f32 %v186_v25, %v139_v22 }
  0x8f   :  { %v250_v28 = vadd.f32 %v181_v26, %v138_v23  ;;  %1147 = vmatprep.subr.bf16.mxu0 %v1146_v24 }
  0x90   :  { %1149 = vmatpush3.bf16.msra.mxu0 %v1146_v24  ;;  %v267_v29 = vmax.f32 %v251_v27, 0.0 }
  0x91   :  { %v266_v30 = vmax.f32 %v250_v28, 0.0  ;;  %v84_v31 = vpop.permute.xlu1 %83 }
  0x92   :  { %v79_v32 = vpop.permute.xlu0 %78  ;;  %v141_v34 = vmul.f32 %v84_v31, %v1518_v8 }
  0x93   :  { %v1150_v33 = vpack.c.bf16 %v267_v29, %v266_v30  ;;  %v140_v35 = vmul.f32 %v79_v32, %v1518_v8 }
  0x95   :  { %1151 = vmatprep.subr.bf16.mxu0 %v1150_v33  ;;  %v196_v36 = vpop.permute.xlu1 %195 }
  0x96   :  { %v191_v37 = vpop.permute.xlu0 %190  ;;  %1153 = vmatpush3.bf16.msra.mxu0 %v1150_v33  ;;  %v253_v38 = vadd.f32 %v196_v36, %v141_v34  ;;  %v282_v36 = vld [vmem:[%s1658_s3 + $0x10] sm:$0xff] }
  0x97   :  { %v252_v39 = vadd.f32 %v191_v37, %v140_v35  ;;  %v281_v35 = vld [vmem:[%s1658_s3 + $0x8] sm:$0xff]  ;;  %v284_v37 = vld [vmem:[%s1658_s3 + $0x20] sm:$0xff] }
  0x98   :  { %v269_v40 = vmax.f32 %v253_v38, 0.0  ;;  %v285_v38 = vld [vmem:[%s1658_s3 + $0x28] sm:$0xff] }
  0x99   :  { %v268_v41 = vmax.f32 %v252_v39, 0.0  ;;  %v94_v42 = vpop.permute.xlu1 %93  ;;  %v286_v39 = vld [vmem:[%s1658_s3 + $0x30] sm:$0xff] }
  0x9a   :  { %v89_v43 = vpop.permute.xlu0 %88  ;;  %v143_v45 = vmul.f32 %v94_v42, %v1518_v8  ;;  %v289_v42 = vld [vmem:[%s1658_s3 + $0x48] sm:$0xff] }
  0x9b   :  { %v1154_v44 = vpack.c.bf16 %v269_v40, %v268_v41  ;;  %v142_v46 = vmul.f32 %v89_v43, %v1518_v8  ;;  %v287_v40 = vld [vmem:[%s1658_s3 + $0x38] sm:$0xff]  ;;  %v288_v41 = vld [vmem:[%s1658_s3 + $0x40] sm:$0xff]  ;;  %v290_v43 = vld [vmem:[%s1658_s3 + $0x50] sm:$0xff] }
  0x9d   :  { %1155 = vmatprep.subr.bf16.mxu0 %v1154_v44  ;;  %v206_v47 = vpop.permute.xlu1 %205 }
  0x9e   :  { %v201_v48 = vpop.permute.xlu0 %200  ;;  %1157 = vmatpush3.bf16.msra.mxu0 %v1154_v44  ;;  %v255_v49 = vadd.f32 %v206_v47, %v143_v45  ;;  %v291_v44 = vld [vmem:[%s1658_s3 + $0x58] sm:$0xff]  ;;  %v292_v45 = vld [vmem:[%s1658_s3 + $0x60] sm:$0xff]  ;;  %v294_v47 = vld [vmem:[%s1658_s3 + $0x70] sm:$0xff] }
  0x9f   :  { %v254_v50 = vadd.f32 %v201_v48, %v142_v46  ;;  %v293_v46 = vld [vmem:[%s1658_s3 + $0x68] sm:$0xff]  ;;  %v295_v48 = vld [vmem:[%s1658_s3 + $0x78] sm:$0xff] }
  0xa0   :  { %v271_v51 = vmax.f32 %v255_v49, 0.0  ;;  %v553_v49 = vld [vmem:[%s1660_s5] sm:$0xff] }
  0xa1   :  { %v270_v52 = vmax.f32 %v254_v50, 0.0  ;;  %v104_v53 = vpop.permute.xlu1 %103  ;;  %1087 = vmatprep.mubr.f32.mxu1 %v553_v49 }
  0xa2   :  { %v99_v54 = vpop.permute.xlu0 %98  ;;  %v145_v56 = vmul.f32 %v104_v53, %v1518_v8 }
  0xa3   :  { %v1158_v55 = vpack.c.bf16 %v271_v51, %v270_v52  ;;  %v144_v57 = vmul.f32 %v99_v54, %v1518_v8 }
  0xa5   :  { %1159 = vmatprep.subr.bf16.mxu0 %v1158_v55  ;;  %v216_v58 = vpop.permute.xlu1 %215 }
  0xa6   :  { %v211_v59 = vpop.permute.xlu0 %210  ;;  %1161 = vmatpush3.bf16.msra.mxu0 %v1158_v55  ;;  %v257_v60 = vadd.f32 %v216_v58, %v145_v56 }
  0xa7   :  { %v256_v61 = vadd.f32 %v211_v59, %v144_v57 }
  0xa8   :  { %v273_v62 = vmax.f32 %v257_v60, 0.0 }
  0xa9   :  { %v272_v63 = vmax.f32 %v256_v61, 0.0  ;;  %v114_v0 = vpop.permute.xlu1 %113 }
  0xaa   :  { %v109_v1 = vpop.permute.xlu0 %108  ;;  %v147_v3 = vmul.f32 %v114_v0, %v1518_v8 }
  0xab   :  { %v1162_v2 = vpack.c.bf16 %v273_v62, %v272_v63  ;;  %v146_v4 = vmul.f32 %v109_v1, %v1518_v8 }
  0xad   :  { %1163 = vmatprep.subr.bf16.mxu0 %v1162_v2  ;;  %v226_v5 = vpop.permute.xlu1 %225 }
  0xae   :  { %v221_v6 = vpop.permute.xlu0 %220  ;;  %1165 = vmatpush3.bf16.msra.mxu0 %v1162_v2  ;;  %v259_v7 = vadd.f32 %v226_v5, %v147_v3 }
  0xaf   :  { %v258_v9 = vadd.f32 %v221_v6, %v146_v4 }
  0xb0   :  { %v275_v10 = vmax.f32 %v259_v7, 0.0 }
  0xb1   :  { %v274_v11 = vmax.f32 %v258_v9, 0.0  ;;  %v124_v12 = vpop.permute.xlu1 %123 }
  0xb2   :  { %v119_v13 = vpop.permute.xlu0 %118  ;;  %v149_v15 = vmul.f32 %v124_v12, %v1518_v8 }
  0xb3   :  { %v1166_v14 = vpack.c.bf16 %v275_v10, %v274_v11  ;;  %v148_v16 = vmul.f32 %v119_v13, %v1518_v8 }
  0xb5   :  { %1167 = vmatprep.subr.bf16.mxu0 %v1166_v14  ;;  %v236_v17 = vpop.permute.xlu1 %235 }
  0xb6   :  { %v231_v18 = vpop.permute.xlu0 %230  ;;  %1169 = vmatpush3.bf16.msra.mxu0 %v1166_v14  ;;  %v261_v19 = vadd.f32 %v236_v17, %v149_v15 }
  0xb7   :  { %v260_v20 = vadd.f32 %v231_v18, %v148_v16 }
  0xb8   :  { %v277_v21 = vmax.f32 %v261_v19, 0.0 }
  0xb9   :  { %v276_v22 = vmax.f32 %v260_v20, 0.0  ;;  %v134_v23 = vpop.permute.xlu1 %133 }
  0xba   :  { %v129_v24 = vpop.permute.xlu0 %128  ;;  %v151_v26 = vmul.f32 %v134_v23, %v1518_v8 }
  0xbb   :  { %v1170_v25 = vpack.c.bf16 %v277_v21, %v276_v22  ;;  %v150_v27 = vmul.f32 %v129_v24, %v1518_v8  ;;  %v283_v8 = vld [vmem:[%s1658_s3 + $0x18] sm:$0xff] }
  0xbd   :  { %1171 = vmatprep.subr.bf16.mxu0 %v1170_v25  ;;  %v246_v28 = vpop.permute.xlu1 %245 }
  0xbe   :  { %v241_v29 = vpop.permute.xlu0 %240  ;;  %1173 = vmatpush3.bf16.msra.mxu0 %v1170_v25  ;;  %v263_v30 = vadd.f32 %v246_v28, %v151_v26 }
  0xbf   :  { %v262_v31 = vadd.f32 %v241_v29, %v150_v27 }
  0xc0   :  { %v279_v32 = vmax.f32 %v263_v30, 0.0 }
  0xc1   :  { %v278_v33 = vmax.f32 %v262_v31, 0.0  ;;  %v320_v50 = vpop.permute.xlu1 %319 }
  0xc2   :  { %v315_v51 = vpop.permute.xlu0 %314 }
  0xc3   :  { %v1174_v34 = vpack.c.bf16 %v279_v32, %v278_v33 }
  0xc5   :  { %1175 = vmatprep.subr.bf16.mxu0 %v1174_v34  ;;  %v330_v52 = vpop.permute.xlu1 %329 }
  0xc6   :  { %1177 = vmatpush3.bf16.msra.mxu0 %v1174_v34  ;;  %v325_v53 = vpop.permute.xlu0 %324 }
  0xc9   :  { %1032 = vmatmul.mubr.f32.vlgmr.msra.gmra.mrb[0].mxu0 %v281_v35  ;;  %v340_v54 = vpop.permute.xlu1 %339 }
  0xca   :  { %1034 = vmatprep.mubr.f32.mxu0 %v282_v36  ;;  %v335_v55 = vpop.permute.xlu0 %334 }
  0xcd   :  { %1035 = vmatmul.mubr.f32.gmra.mrb[2].mxu0 %v283_v8  ;;  %v350_v61 = vpop.permute.xlu1 %349 }
  0xce   :  { %1037 = vmatprep.mubr.f32.mxu0 %v284_v37  ;;  %v345_v0 = vpop.permute.xlu0 %344 }
  0xd1   :  { %1038 = vmatmul.mubr.f32.gmra.mrb[4].mxu0 %v285_v38  ;;  %v360_v11 = vpop.permute.xlu1 %359 }
  0xd2   :  { %1040 = vmatprep.mubr.f32.mxu0 %v286_v39  ;;  %v355_v14 = vpop.permute.xlu0 %354 }
  0xd5   :  { %1041 = vmatmul.mubr.f32.gmra.mrb[6].mxu0 %v287_v40  ;;  %v370_v23 = vpop.permute.xlu1 %369 }
  0xd6   :  { %1043 = vmatprep.mubr.f32.mxu0 %v288_v41  ;;  %v365_v26 = vpop.permute.xlu0 %364 }
  0xd9   :  { %1044 = vmatmul.mubr.f32.gmra.mrb[8].mxu0 %v289_v42  ;;  %v380_v36 = vpop.permute.xlu1 %379 }
  0xda   :  { %1046 = vmatprep.mubr.f32.mxu0 %v290_v43  ;;  %v375_v38 = vpop.permute.xlu0 %374 }
  0xdd   :  { %1047 = vmatmul.mubr.f32.gmra.mrb[10].mxu0 %v291_v44 }
  0xde   :  { %1049 = vmatprep.mubr.f32.mxu0 %v292_v45 }
  0xe1   :  { %1050 = vmatmul.mubr.f32.gmra.mrb[12].mxu0 %v293_v46 }
  0xe2   :  { %1052 = vmatprep.mubr.f32.mxu0 %v294_v47  ;;  %v390_v47 = vpop.permute.xlu1 %389 }
  0xe5   :  { %1053 = vmatmul.mubr.f32.gmra.mrb[14].mxu0 %v295_v48 }
 0x19c   :  { %v1033_v56 = vpop.f32.mrb[0].mxu0 }
 0x19d   :  { %v464_v57 = vadd.f32 %v1033_v56, %v320_v50  ;;  %v458_v58 = vpop.f32.mrb[1].mxu0  ;;  %v385_v50 = vpop.permute.xlu0 %384 }
 0x19e   :  { %v459_v59 = vadd.f32 %v458_v58, %v315_v51  ;;  %v554_v58 = vld [vmem:[%s1660_s5 + $0x8] sm:$0xff] }
 0x19f   :  { %v538_v60 = vmax.f32 %v464_v57, 0.0 }
 0x1a0   :  { %v537_v62 = vmax.f32 %v459_v59, 0.0  ;;  %v1036_v63 = vpop.f32.mrb[2].mxu0  ;;  %v555_v59 = vld [vmem:[%s1660_s5 + $0x10] sm:$0xff] }
 0x1a1   :  { %v474_v1 = vadd.f32 %v1036_v63, %v330_v52  ;;  %v468_v2 = vpop.f32.mrb[3].mxu0  ;;  %v559_v63 = vld [vmem:[%s1660_s5 + $0x30] sm:$0xff] }
 0x1a2   :  { %v469_v3 = vadd.f32 %v468_v2, %v325_v53  ;;  %v1178_v4 = vpack.c.bf16 %v538_v60, %v537_v62  ;;  %v556_v60 = vld [vmem:[%s1660_s5 + $0x18] sm:$0xff]  ;;  %v558_v62 = vld [vmem:[%s1660_s5 + $0x28] sm:$0xff] }
 0x1a3   :  { %v540_v5 = vmax.f32 %v474_v1, 0.0  ;;  %v561_v1 = vld [vmem:[%s1660_s5 + $0x40] sm:$0xff]  ;;  %v562_v2 = vld [vmem:[%s1660_s5 + $0x48] sm:$0xff] }
 0x1a4   :  { %v539_v6 = vmax.f32 %v469_v3, 0.0  ;;  %v1039_v7 = vpop.f32.mrb[4].mxu0  ;;  %1179 = vmatprep.subr.bf16.mxu1 %v1178_v4  ;;  %v563_v3 = vld [vmem:[%s1660_s5 + $0x50] sm:$0xff] }
 0x1a5   :  { %v484_v9 = vadd.f32 %v1039_v7, %v340_v54  ;;  %v478_v10 = vpop.f32.mrb[5].mxu0  ;;  %1181 = vmatpush3.bf16.msra.mxu1 %v1178_v4  ;;  %v564_v4 = vld [vmem:[%s1660_s5 + $0x58] sm:$0xff]  ;;  %v567_v7 = vld [vmem:[%s1660_s5 + $0x70] sm:$0xff] }
 0x1a6   :  { %v1182_v12 = vpack.c.bf16 %v540_v5, %v539_v6  ;;  %v479_v13 = vadd.f32 %v478_v10, %v335_v55  ;;  %v565_v5 = vld [vmem:[%s1660_s5 + $0x60] sm:$0xff]  ;;  %v566_v6 = vld [vmem:[%s1660_s5 + $0x68] sm:$0xff]  ;;  %v1266_v10 = vmov 0.0|0.0  }
 0x1a7   :  { %v542_v15 = vmax.f32 %v484_v9, 0.0  ;;  %v568_v9 = vld [vmem:[%s1660_s5 + $0x78] sm:$0xff]  ;;  %1210 = vmatprep.subr.bf16.mxu0 %v1266_v10 }
 0x1a8   :  { %v541_v16 = vmax.f32 %v479_v13, 0.0  ;;  %v1042_v17 = vpop.f32.mrb[6].mxu0  ;;  %1183 = vmatprep.subr.bf16.mxu1 %v1182_v12  ;;  %v588_v13 = vpop.permute.xlu0 %587 }
 0x1a9   :  { %v494_v18 = vadd.f32 %v1042_v17, %v350_v61  ;;  %v488_v19 = vpop.f32.mrb[7].mxu0  ;;  %1185 = vmatpush3.bf16.msra.mxu1 %v1182_v12  ;;  %v557_v61 = vld [vmem:[%s1660_s5 + $0x20] sm:$0xff]  ;;  %v593_v12 = vpop.permute.xlu1 %592 }
 0x1aa   :  { %v1186_v20 = vpack.c.bf16 %v542_v15, %v541_v16  ;;  %v489_v21 = vadd.f32 %v488_v19, %v345_v0  ;;  %v560_v0 = vld [vmem:[%s1660_s5 + $0x38] sm:$0xff] }
 0x1ab   :  { %v544_v22 = vmax.f32 %v494_v18, 0.0 }
 0x1ac   :  { %v543_v24 = vmax.f32 %v489_v21, 0.0  ;;  %v1045_v25 = vpop.f32.mrb[8].mxu0  ;;  %1187 = vmatprep.subr.bf16.mxu1 %v1186_v20  ;;  %v598_v15 = vpop.permute.xlu0 %597 }
 0x1ad   :  { %v504_v27 = vadd.f32 %v1045_v25, %v360_v11  ;;  %v498_v28 = vpop.f32.mrb[9].mxu0  ;;  %1189 = vmatpush3.bf16.msra.mxu1 %v1186_v20  ;;  %v1268_v11 = vmov 0.0  }
 0x1ae   :  { %v1190_v29 = vpack.c.bf16 %v544_v22, %v543_v24  ;;  %v499_v30 = vadd.f32 %v498_v28, %v355_v14  ;;  %1143 = vmatprep.mubr.msk.f32.mxu0 %vm1267_vm0, %v1268_v11  ;;  %v603_v14 = vpop.permute.xlu1 %602 }
 0x1af   :  { %v546_v31 = vmax.f32 %v504_v27, 0.0 }
 0x1b0   :  { %v545_v32 = vmax.f32 %v499_v30, 0.0  ;;  %v1048_v33 = vpop.f32.mrb[10].mxu0  ;;  %1191 = vmatprep.subr.bf16.mxu1 %v1190_v29  ;;  %v608_v17 = vpop.permute.xlu0 %607 }
 0x1b1   :  { %v514_v34 = vadd.f32 %v1048_v33, %v370_v23  ;;  %v508_v35 = vpop.f32.mrb[11].mxu0  ;;  %1193 = vmatpush3.bf16.msra.mxu1 %v1190_v29 }
 0x1b2   :  { %v1194_v8 = vpack.c.bf16 %v546_v31, %v545_v32  ;;  %v509_v37 = vadd.f32 %v508_v35, %v365_v26  ;;  %v613_v16 = vpop.permute.xlu1 %612 }
 0x1b3   :  { %v548_v39 = vmax.f32 %v514_v34, 0.0 }
 0x1b4   :  { %v547_v40 = vmax.f32 %v509_v37, 0.0  ;;  %v1051_v41 = vpop.f32.mrb[12].mxu0  ;;  %1195 = vmatprep.subr.bf16.mxu1 %v1194_v8  ;;  %v618_v26 = vpop.permute.xlu0 %617 }
 0x1b5   :  { %v524_v42 = vadd.f32 %v1051_v41, %v380_v36  ;;  %v518_v43 = vpop.f32.mrb[13].mxu0  ;;  %1197 = vmatpush3.bf16.msra.mxu1 %v1194_v8 }
 0x1b6   :  { %v1198_v44 = vpack.c.bf16 %v548_v39, %v547_v40  ;;  %v519_v45 = vadd.f32 %v518_v43, %v375_v38  ;;  %v623_v23 = vpop.permute.xlu1 %622 }
 0x1b7   :  { %v550_v46 = vmax.f32 %v524_v42, 0.0 }
 0x1b8   :  { %v549_v48 = vmax.f32 %v519_v45, 0.0  ;;  %v1054_v49 = vpop.f32.mrb[14].mxu0  ;;  %1199 = vmatprep.subr.bf16.mxu1 %v1198_v44  ;;  %v628_v38 = vpop.permute.xlu0 %627 }
 0x1b9   :  { %v534_v51 = vadd.f32 %v1054_v49, %v390_v47  ;;  %v528_v52 = vpop.f32.mrb[15].mxu0  ;;  %1201 = vmatpush3.bf16.msra.mxu1 %v1198_v44 }
 0x1ba   :  { %v1202_v53 = vpack.c.bf16 %v550_v46, %v549_v48  ;;  %v529_v54 = vadd.f32 %v528_v52, %v385_v50  ;;  %v633_v36 = vpop.permute.xlu1 %632 }
 0x1bb   :  { %v552_v55 = vmax.f32 %v534_v51, 0.0 }
 0x1bc   :  { %v551_v56 = vmax.f32 %v529_v54, 0.0  ;;  %1203 = vmatprep.subr.bf16.mxu1 %v1202_v53  ;;  %v638_v50 = vpop.permute.xlu0 %637 }
 0x1bd   :  { %1205 = vmatpush3.bf16.msra.mxu1 %v1202_v53 }
 0x1be   :  { %v1206_v57 = vpack.c.bf16 %v552_v55, %v551_v56  ;;  %v643_v47 = vpop.permute.xlu1 %642 }
 0x1c0   :  { %1207 = vmatprep.subr.bf16.mxu1 %v1206_v57 }
 0x1c1   :  { %1209 = vmatpush3.bf16.msra.mxu1 %v1206_v57 }
 0x1c4   :  { %1088 = vmatmul.mubr.f32.vlgmr.msra.gmra.mrb[0].mxu1 %v554_v58 }
 0x1c5   :  { %1090 = vmatprep.mubr.f32.mxu1 %v555_v59 }
 0x1c8   :  { %1091 = vmatmul.mubr.f32.gmra.mrb[2].mxu1 %v556_v60  ;;  %v653_v60 = vpop.permute.xlu1 %652 }
 0x1c9   :  { %1093 = vmatprep.mubr.f32.mxu1 %v557_v61 }
 0x1cc   :  { %1094 = vmatmul.mubr.f32.gmra.mrb[4].mxu1 %v558_v62 }
 0x1cd   :  { %1096 = vmatprep.mubr.f32.mxu1 %v559_v63  ;;  %v648_v63 = vpop.permute.xlu0 %647 }
 0x1d0   :  { %1097 = vmatmul.mubr.f32.gmra.mrb[6].mxu1 %v560_v0 }
 0x1d1   :  { %1099 = vmatprep.mubr.f32.mxu1 %v561_v1 }
 0x1d4   :  { %1100 = vmatmul.mubr.f32.gmra.mrb[8].mxu1 %v562_v2 }
 0x1d5   :  { %1102 = vmatprep.mubr.f32.mxu1 %v563_v3 }
 0x1d8   :  { %1103 = vmatmul.mubr.f32.gmra.mrb[10].mxu1 %v564_v4 }
 0x1d9   :  { %1105 = vmatprep.mubr.f32.mxu1 %v565_v5 }
 0x1dc   :  { %1106 = vmatmul.mubr.f32.gmra.mrb[12].mxu1 %v566_v6 }
 0x1dd   :  { %1108 = vmatprep.mubr.f32.mxu1 %v567_v7 }
 0x1e0   :  { %1109 = vmatmul.mubr.f32.gmra.mrb[14].mxu1 %v568_v9  ;;  %v663_v9 = vpop.permute.xlu1 %662 }
 0x297   :  { %v1089_v18 = vpop.f32.mrb[0].mxu1 }
 0x298   :  { %v737_v19 = vadd.f32 %v1089_v18, %v593_v12  ;;  %v731_v20 = vpop.f32.mrb[1].mxu1 }
 0x299   :  { %v732_v21 = vadd.f32 %v731_v20, %v588_v13  ;;  %v658_v13 = vpop.permute.xlu0 %657 }
 0x29a   :  { %v811_v22 = vmax.f32 %v737_v19, 0.0 }
 0x29b   :  { %v810_v24 = vmax.f32 %v732_v21, 0.0  ;;  %v1092_v25 = vpop.f32.mrb[2].mxu1  ;;  %v826_v21 = vld [vmem:[%s1662_s7] sm:$0xff] }
 0x29c   :  { %v747_v27 = vadd.f32 %v1092_v25, %v603_v14  ;;  %v741_v28 = vpop.f32.mrb[3].mxu1 }
 0x29d   :  { %v1211_v29 = vpack.c.bf16 %v811_v22, %v810_v24  ;;  %v742_v30 = vadd.f32 %v741_v28, %v598_v15  ;;  %v831_v22 = vpop.permute.xlu0 %830 }
 0x29e   :  { %v813_v31 = vmax.f32 %v747_v27, 0.0 }
 0x29f   :  { %v812_v32 = vmax.f32 %v742_v30, 0.0  ;;  %v1095_v33 = vpop.f32.mrb[4].mxu1  ;;  %1212 = vmatpush3.bf16.msra.mxu0 %v1211_v29 }
 0x2a0   :  { %v757_v34 = vadd.f32 %v1095_v33, %v613_v16  ;;  %v751_v35 = vpop.f32.mrb[5].mxu1  ;;  %1213 = vmatprep.subr.bf16.mxu0 %v1266_v10 }
 0x2a1   :  { %v1214_v8 = vpack.c.bf16 %v813_v31, %v812_v32  ;;  %v752_v37 = vadd.f32 %v751_v35, %v608_v17 }
 0x2a2   :  { %v815_v39 = vmax.f32 %v757_v34, 0.0 }
 0x2a3   :  { %v814_v40 = vmax.f32 %v752_v37, 0.0  ;;  %v1098_v41 = vpop.f32.mrb[6].mxu1  ;;  %1215 = vmatpush3.bf16.msra.mxu0 %v1214_v8 }
 0x2a4   :  { %v767_v42 = vadd.f32 %v1098_v41, %v623_v23  ;;  %v761_v43 = vpop.f32.mrb[7].mxu1  ;;  %1216 = vmatprep.subr.bf16.mxu0 %v1266_v10 }
 0x2a5   :  { %v1217_v44 = vpack.c.bf16 %v815_v39, %v814_v40  ;;  %v762_v45 = vadd.f32 %v761_v43, %v618_v26 }
 0x2a6   :  { %v817_v46 = vmax.f32 %v767_v42, 0.0 }
 0x2a7   :  { %v816_v48 = vmax.f32 %v762_v45, 0.0  ;;  %v1101_v49 = vpop.f32.mrb[8].mxu1  ;;  %1218 = vmatpush3.bf16.msra.mxu0 %v1217_v44 }
 0x2a8   :  { %v777_v51 = vadd.f32 %v1101_v49, %v633_v36  ;;  %v771_v52 = vpop.f32.mrb[9].mxu1  ;;  %1219 = vmatprep.subr.bf16.mxu0 %v1266_v10 }
 0x2a9   :  { %v1220_v53 = vpack.c.bf16 %v817_v46, %v816_v48  ;;  %v772_v54 = vadd.f32 %v771_v52, %v628_v38 }
 0x2aa   :  { %v819_v55 = vmax.f32 %v777_v51, 0.0 }
 0x2ab   :  { %v818_v56 = vmax.f32 %v772_v54, 0.0  ;;  %v1104_v57 = vpop.f32.mrb[10].mxu1  ;;  %1221 = vmatpush3.bf16.msra.mxu0 %v1220_v53 }
 0x2ac   :  { %v787_v58 = vadd.f32 %v1104_v57, %v643_v47  ;;  %v781_v59 = vpop.f32.mrb[11].mxu1  ;;  %1222 = vmatprep.subr.bf16.mxu0 %v1266_v10 }
 0x2ad   :  { %v1223_v61 = vpack.c.bf16 %v819_v55, %v818_v56  ;;  %v782_v62 = vadd.f32 %v781_v59, %v638_v50 }
 0x2ae   :  { %v821_v0 = vmax.f32 %v787_v58, 0.0 }
 0x2af   :  { %v820_v1 = vmax.f32 %v782_v62, 0.0  ;;  %v1107_v2 = vpop.f32.mrb[12].mxu1  ;;  %1224 = vmatpush3.bf16.msra.mxu0 %v1223_v61 }
 0x2b0   :  { %v797_v3 = vadd.f32 %v1107_v2, %v653_v60  ;;  %v791_v4 = vpop.f32.mrb[13].mxu1  ;;  %1225 = vmatprep.subr.bf16.mxu0 %v1266_v10 }
 0x2b1   :  { %v1226_v5 = vpack.c.bf16 %v821_v0, %v820_v1  ;;  %v792_v6 = vadd.f32 %v791_v4, %v648_v63 }
 0x2b2   :  { %v823_v7 = vmax.f32 %v797_v3, 0.0 }
 0x2b3   :  { %v822_v11 = vmax.f32 %v792_v6, 0.0  ;;  %v1110_v12 = vpop.f32.mrb[14].mxu1  ;;  %1227 = vmatpush3.bf16.msra.mxu0 %v1226_v5 }
 0x2b4   :  { %v807_v14 = vadd.f32 %v1110_v12, %v663_v9  ;;  %v801_v15 = vpop.f32.mrb[15].mxu1  ;;  %1228 = vmatprep.subr.bf16.mxu0 %v1266_v10 }
 0x2b5   :  { %v1229_v16 = vpack.c.bf16 %v823_v7, %v822_v11  ;;  %v802_v17 = vadd.f32 %v801_v15, %v658_v13 }
 0x2b6   :  { %v825_v18 = vmax.f32 %v807_v14, 0.0 }
 0x2b7   :  { %v824_v19 = vmax.f32 %v802_v17, 0.0  ;;  %1230 = vmatpush3.bf16.msra.mxu0 %v1229_v16 }
 0x2b8   :  { %1231 = vmatprep.subr.bf16.mxu0 %v1266_v10 }
 0x2b9   :  { %v1232_v20 = vpack.c.bf16 %v825_v18, %v824_v19 }
 0x2bb   :  { %1233 = vmatpush3.bf16.msra.mxu0 %v1232_v20 }
 0x2be   :  { %1144 = vmatmul.mubr.f32.vlgmr.msra.gmra.mrb[16].mxu0 %v826_v21 }
 0x391   :  { %v899_v23 = vpop.f32.mrb[16].mxu0 }
 0x392   :  { %v900_v24 = vadd.f32 %v899_v23, %v831_v22  ;;  %v1145_v25 = vpop.f32.mrb[17].mxu0 }
 0x394   :  { %903 = vst [vmem:[#allocation2] sm:$0xff] %v900_v24 }
 0x395   :  { %1252 = shalt.err (!%p1249_p4)
}
 0x396   :  { %s1253_s7 = scalar_lea.hbm %s1664_s9, 128 }
 0x397   :  { %p1254_p5 = scmp.ne.s32.totalorder %s1664_s9, %s1253_s7  ;;  %p1257_p6 = scmp.lt.u32.totalorder %s1253_s7, %s1664_s9 }
 0x399   :  { %p1259_p7 = pnand %p1257_p6, %p1254_p5 }
 0x39b   :  { %1262 = shalt.err (!%p1259_p7)
}
 0x39c   :  { %913 = dma.vmem_to_hbm [thread:$0]  %s911_s1, 128, %s1664_s9, [#allocation3]  }
 0x39d   :  { %1263 = dma.done.wait [#allocation3], 128  }
 0x39e   :  { %1264 = vsyncadd [#allocation3], 4294967168 }
 0x39f   :  { %917 = vsyncpa [#allocation3], 1 }

</bundles_post_ra>
